<compile_context>
chip_gen: v5e
topology: v5e:2x2
jax: 0.10.0
libtpu: 0.0.40
codegen_flags: <defaults>
</compile_context>

<pallas_src>
import functools

import jax
import jax.numpy as jnp
from jax.experimental import pallas as pl
from jax.experimental.pallas import tpu as pltpu


# Row indices inside the packed per-column constant tile (sublane-aligned (8, H) f32).
_ROW_HZ = 0        # hidden_z
_ROW_BIAS_HZ = 1   # bias * hidden_z
_ROW_GAMMA = 2     # LN gamma, zeroed on pruned columns
_ROW_BETA = 3      # LN beta,  zeroed on pruned columns


def _cofi_post_proj_kernel(x_ref, w_ref, consts_ref, invk_ref, o_ref, acc_ref, *, eps):
    """Grid = (row tiles, K slabs).  One (tm, H) output row tile; F streamed along axis 1."""
    k = pl.program_id(1)
    k_last = pl.num_programs(1) - 1

    @pl.when(k == 0)
    def _init():
        acc_ref[...] = jnp.zeros_like(acc_ref)

    # MXU matmul in the native input dtype (bf16 stays bf16) with f32 accumulation.
    acc_ref[...] += jnp.dot(x_ref[...], w_ref[...], preferred_element_type=jnp.float32)

    @pl.when(k == k_last)
    def _finalize():
        c = consts_ref[...]                                  # (8, H) f32, grid-invariant
        hz = c[_ROW_HZ:_ROW_HZ + 1, :]                       # hidden_z
        b_hz = c[_ROW_BIAS_HZ:_ROW_BIAS_HZ + 1, :]           # bias * hidden_z
        gamma_m = c[_ROW_GAMMA:_ROW_GAMMA + 1, :]            # masked LN gamma
        beta_m = c[_ROW_BETA:_ROW_BETA + 1, :]               # masked LN beta
        inv_k = invk_ref[0]                                  # SMEM scalar: 1 / #nonzero(hidden_z)

        # y = (x @ W^T + b) * hidden_z ; pruned columns are exactly 0.
        y = acc_ref[...] * hz + b_hz                         # (tm, H) f32

        # Masked layer-norm statistics over the kept columns: pruned columns contribute 0 to
        # both sums, so dividing the full-row sums by k equals the compressed-row statistics.
        s1 = jnp.sum(y, axis=-1, keepdims=True)              # (tm, 1)
        s2 = jnp.sum(y * y, axis=-1, keepdims=True)          # (tm, 1)
        mean = s1 * inv_k
        var = jnp.maximum(s2 * inv_k - mean * mean, 0.0)     # clamp single-pass cancellation
        rstd = jax.lax.rsqrt(var + eps)                      # EUP slot

        # normed = (y - mean) * rstd * gamma + beta, fused as one scale + shift per element.
        # Pre-masked gamma/beta leave pruned columns at exactly 0 (== their y value).
        scale = rstd * gamma_m
        shift = beta_m - mean * scale
        o_ref[...] = (y * scale + shift).astype(o_ref.dtype)


def _round_up(n, m):
    return ((n + m - 1) // m) * m


def _vmem_capacity_bytes():
    try:
        return int(pltpu.get_tpu_info().vmem_capacity_bytes)
    except Exception:
        return 64 * 1024 * 1024   # conservative (v7x per-TC VMEM)


def _pick_tk(F, max_tk=512):
    """K-tile for the contraction axis (W^T streamed in (tk, H) slabs).

    tk always divides F exactly (or equals F), so the K grid axis is never ragged and the
    accumulator only ever sees valid data along the reduction.
    """
    if F <= max_tk:
        return F
    for cand in (512, 384, 256, 128):      # multiples of 128 -> legal lane dim for x blocks
        if F % cand == 0:
            return cand
    return F                               # no nice divisor: keep the weight fully resident


def cofi_post_proj(feature_extractor_output, weight_t, bias, ln_weight, ln_bias,
                   hidden_z=None, *, eps=1e-5, tm=None, tk=None, matmul_dtype=None):
    """CoFiPostProj forward.

    feature_extractor_output : [B, T, F]
    weight_t                 : [F, H] -- nn.Linear weight stored PRE-TRANSPOSED (done once
                               at parameter init, not per forward call)
    bias, ln_weight, ln_bias : [H]
    hidden_z                 : [H] or None (None == no pruning, plain LayerNorm)
    matmul_dtype             : optional dtype to force the MXU matmul into (e.g. jnp.bfloat16
                               on v5e when the caller holds f32 params); epilogue stays f32.
    """
    B, T, F = feature_extractor_output.shape
    Fw, H = weight_t.shape
    assert Fw == F, "weight_t must be the (F, H) transposed Linear weight"
    M = B * T

    vmem_cap = _vmem_capacity_bytes()
    if tm is None:
        tm = 512 if vmem_cap >= 96 * 1024 * 1024 else 256   # v5e/v6e (128 MiB) vs v7x (64 MiB)
    tm = _round_up(tm, 8)
    if tk is None:
        tk = _pick_tk(F)
    assert F % tk == 0

    # Row tile: either a multiple of 8 (ragged last block handled by Pallas via masked
    # write-back) or the full row count.  No jnp.pad / out[:M] HBM round-trips.
    tm_eff = min(tm, M)

    x2d = feature_extractor_output.reshape(M, F)
    out_dtype = feature_extractor_output.dtype

    if matmul_dtype is not None:
        x2d = x2d.astype(matmul_dtype)
        weight_t = weight_t.astype(matmul_dtype)

    # Grid-invariant per-column constants folded ONCE (O(H)) in the wrapper and packed into a
    # single sublane-aligned (8, H) f32 tile (one DMA descriptor instead of four); 1/#kept is
    # a single SMEM scalar instead of a broadcast (1,1) VMEM tile.
    if hidden_z is None:
        hidden_z = jnp.ones((H,), jnp.float32)
    hzf = hidden_z.astype(jnp.float32)
    maskf = (hzf != 0.0).astype(jnp.float32)
    n_kept = jnp.maximum(jnp.sum(maskf), 1.0)
    inv_k = (1.0 / n_kept).reshape(1).astype(jnp.float32)
    consts = jnp.zeros((8, H), jnp.float32)
    consts = consts.at[_ROW_HZ].set(hzf)
    consts = consts.at[_ROW_BIAS_HZ].set(bias.astype(jnp.float32) * hzf)
    consts = consts.at[_ROW_GAMMA].set(ln_weight.astype(jnp.float32) * maskf)
    consts = consts.at[_ROW_BETA].set(ln_bias.astype(jnp.float32) * maskf)

    num_m = pl.cdiv(M, tm_eff)
    num_k = F // tk

    kernel = functools.partial(_cofi_post_proj_kernel, eps=eps)

    x_bytes = x2d.size * x2d.dtype.itemsize
    w_bytes = weight_t.size * weight_t.dtype.itemsize
    out_bytes = M * H * jnp.dtype(out_dtype).itemsize
    cost = pl.CostEstimate(
        flops=2 * M * F * H,
        transcendentals=M,                                   # one rsqrt per row
        bytes_accessed=x_bytes + w_bytes + out_bytes + consts.size * 4 + 4,
    )

    out2d = pl.pallas_call(
        kernel,
        out_shape=jax.ShapeDtypeStruct((M, H), out_dtype),
        grid=(num_m, num_k),
        in_specs=[
            pl.BlockSpec((tm_eff, tk), lambda i, k: (i, k)),        # x rows (streamed)
            pl.BlockSpec((tk, H), lambda i, k: (k, 0)),             # W^T K-slab (streamed)
            pl.BlockSpec((8, H), lambda i, k: (0, 0)),              # packed per-column consts
            pl.BlockSpec(memory_space=pltpu.MemorySpace.SMEM),      # 1/#kept scalar
        ],
        out_specs=pl.BlockSpec((tm_eff, H), lambda i, k: (i, 0)),   # resident across K
        scratch_shapes=[pltpu.VMEM((tm_eff, H), jnp.float32)],      # f32 accumulator
        compiler_params=pltpu.CompilerParams(
            # Rows are embarrassingly parallel (v7x 2-TC megacore); K is the reduction axis.
            dimension_semantics=("parallel", "arbitrary"),
            vmem_limit_bytes=int(min(vmem_cap * 7 // 8, 100 * 1024 * 1024)),
        ),
        cost_estimate=cost,
    )(x2d, weight_t, consts, inv_k)

    return out2d.reshape(B, T, H)


def _reference(x, weight, bias, ln_weight, ln_bias, hidden_z, eps=1e-5):
    """Plain-JAX replica of the PyTorch forward (gather/scatter form) for checking."""
    proj = jnp.einsum("btf,hf->bth", x, weight) + bias
    y = proj * hidden_z
    idx = jnp.where(hidden_z != 0)[0]               # concrete outside jit
    comp = y[..., idx]
    mean = comp.mean(axis=-1, keepdims=True)
    var = ((comp - mean) ** 2).mean(axis=-1, keepdims=True)
    normed = (comp - mean) / jnp.sqrt(var + eps) * ln_weight[idx] + ln_bias[idx]
    return y.at[..., idx].set(normed)


if __name__ == "__main__":
    B, T, F, H = 2, 8, 32, 32
    key = jax.random.PRNGKey(0)
    k_x, k_w, k_b, k_g, k_be, k_z = jax.random.split(key, 6)

    x = jax.random.normal(k_x, (B, T, F), jnp.float32)
    weight = jax.random.normal(k_w, (H, F), jnp.float32) * 0.1     # nn.Linear weight [out, in]
    bias = jax.random.normal(k_b, (H,), jnp.float32) * 0.1
    ln_weight = 1.0 + 0.05 * jax.random.normal(k_g, (H,), jnp.float32)
    ln_bias = 0.05 * jax.random.normal(k_be, (H,), jnp.float32)

    # hidden_z: CoFi structured-pruning mask/scale — some exact zeros, rest in (0, 1]
    hz_vals = jax.random.uniform(k_z, (H,), jnp.float32, minval=0.1, maxval=1.0)
    keep = (jnp.arange(H) % 4 != 3)                                # drop every 4th hidden dim
    hidden_z = jnp.where(keep, hz_vals, 0.0)

    # "Parameter init": store the Linear weight pre-transposed ONCE (not in the forward path).
    weight_t = jnp.asarray(weight.T)                               # (F, H)

    ref = _reference(x, weight, bias, ln_weight, ln_bias, hidden_z, eps=1e-5)

    # f32 path (native dtype matmul, f32 accumulate + epilogue).
    out = cofi_post_proj(x, weight_t, bias, ln_weight, ln_bias, hidden_z, eps=1e-5)
    out = jax.block_until_ready(out)
    assert out.shape == (B, T, H)
    assert jnp.allclose(out, ref, rtol=1e-4, atol=1e-4), "f32 mismatch vs reference"

    # bf16 path (what a v5e/bf16 deployment uses): bf16 MXU matmul, f32 epilogue, bf16 output.
    out_bf16 = cofi_post_proj(x.astype(jnp.bfloat16), weight_t.astype(jnp.bfloat16),
                              bias, ln_weight, ln_bias, hidden_z, eps=1e-5)
    out_bf16 = jax.block_until_ready(out_bf16)
    assert out_bf16.shape == (B, T, H)
    assert jnp.allclose(out_bf16.astype(jnp.float32), ref, rtol=5e-2, atol=1e-1), \
        "bf16 mismatch vs reference"

    print("KERNEL_OK")
</pallas_src>

<mosaic_0001>
module attributes {stable_mosaic.version = 11 : i64} {
  func.func @_cofi_post_proj_kernel(%arg0: i32, %arg1: i32, %arg2: memref<16x32xf32, #tpu.memory_space<vmem>>, %arg3: memref<32x32xf32, #tpu.memory_space<vmem>>, %arg4: memref<8x32xf32, #tpu.memory_space<vmem>>, %arg5: memref<1xf32, #tpu.memory_space<smem>>, %arg6: memref<16x32xf32, #tpu.memory_space<vmem>>, %arg7: memref<16x32xf32, #tpu.memory_space<vmem>>) attributes {dimension_semantics = [#tpu.dimension_semantics<parallel>, #tpu.dimension_semantics<arbitrary>], iteration_bounds = array<i64: 1, 1>, scalar_prefetch = 0 : i64, scratch_operands = 1 : i64, tpu.core_type = #tpu.core_type<tc>, window_params = [{transform_indices = @transform_0, window_bounds = array<i64: 16, 32>}, {transform_indices = @transform_1, window_bounds = array<i64: 32, 32>}, {pipeline_mode = #tpu.pipeline_mode<synchronous>, transform_indices = @transform_2, window_bounds = array<i64: 8, 32>}, {transform_indices = @transform_3, window_bounds = array<i64: 1>}, {transform_indices = @transform_4, window_bounds = array<i64: 16, 32>}]} {
    %c0_i32 = arith.constant 0 : i32
    %0 = arith.cmpi eq, %arg1, %c0_i32 : i32
    %1 = arith.extui %0 : i1 to i32
    %c0_i32_0 = arith.constant 0 : i32
    %2 = arith.cmpi ne, %1, %c0_i32_0 : i32
    scf.if %2 {
      %cst_10 = arith.constant 0.000000e+00 : f32
      %12 = vector.broadcast %cst_10 : f32 to vector<16x32xf32>
      %c0_11 = arith.constant 0 : index
      %c0_12 = arith.constant 0 : index
      %13 = vector.load %arg7[%c0_11, %c0_12] : memref<16x32xf32, #tpu.memory_space<vmem>>, vector<16x32xf32>
      tpu.vector_store %arg7[%c0_11, %c0_12], %12 {strides = array<i32>} : memref<16x32xf32, #tpu.memory_space<vmem>>, vector<16x32xf32>,
    } else {
    }
    %c0 = arith.constant 0 : index
    %c0_1 = arith.constant 0 : index
    %3 = vector.load %arg7[%c0, %c0_1] : memref<16x32xf32, #tpu.memory_space<vmem>>, vector<16x32xf32>
    %c0_2 = arith.constant 0 : index
    %c0_3 = arith.constant 0 : index
    %4 = vector.load %arg2[%c0_2, %c0_3] : memref<16x32xf32, #tpu.memory_space<vmem>>, vector<16x32xf32>
    %c0_4 = arith.constant 0 : index
    %c0_5 = arith.constant 0 : index
    %5 = vector.load %arg3[%c0_4, %c0_5] : memref<32x32xf32, #tpu.memory_space<vmem>>, vector<32x32xf32>
    %cst = arith.constant dense<0.000000e+00> : vector<16x32xf32>
    %6 = tpu.matmul %4, %5, %cst {dimension_numbers = #tpu.dot_dimension_numbers<[1], [0], [0], [1], [0, 0, 1, 1], [], []>} : vector<16x32xf32>, vector<32x32xf32>, vector<16x32xf32> -> vector<16x32xf32>
    %7 = arith.addf %3, %6 : vector<16x32xf32>
    %c0_6 = arith.constant 0 : index
    %c0_7 = arith.constant 0 : index
    %8 = vector.load %arg7[%c0_6, %c0_7] : memref<16x32xf32, #tpu.memory_space<vmem>>, vector<16x32xf32>
    tpu.vector_store %arg7[%c0_6, %c0_7], %7 {strides = array<i32>} : memref<16x32xf32, #tpu.memory_space<vmem>>, vector<16x32xf32>,
    %c0_i32_8 = arith.constant 0 : i32
    %9 = arith.cmpi eq, %arg1, %c0_i32_8 : i32
    %10 = arith.extui %9 : i1 to i32
    %c0_i32_9 = arith.constant 0 : i32
    %11 = arith.cmpi ne, %10, %c0_i32_9 : i32
    scf.if %11 {
      %c0_10 = arith.constant 0 : index
      %c0_11 = arith.constant 0 : index
      %12 = vector.load %arg4[%c0_10, %c0_11] : memref<8x32xf32, #tpu.memory_space<vmem>>, vector<8x32xf32>
      %13 = vector.extract_strided_slice %12 {offsets = [0, 0], sizes = [1, 32], strides = [1, 1]} : vector<8x32xf32> to vector<1x32xf32>
      %14 = vector.extract_strided_slice %12 {offsets = [1, 0], sizes = [1, 32], strides = [1, 1]} : vector<8x32xf32> to vector<1x32xf32>
      %15 = vector.extract_strided_slice %12 {offsets = [2, 0], sizes = [1, 32], strides = [1, 1]} : vector<8x32xf32> to vector<1x32xf32>
      %16 = vector.extract_strided_slice %12 {offsets = [3, 0], sizes = [1, 32], strides = [1, 1]} : vector<8x32xf32> to vector<1x32xf32>
      %c0_12 = arith.constant 0 : index
      %17 = memref.load %arg5[%c0_12] : memref<1xf32, #tpu.memory_space<smem>>
      %c0_13 = arith.constant 0 : index
      %c0_14 = arith.constant 0 : index
      %18 = vector.load %arg7[%c0_13, %c0_14] : memref<16x32xf32, #tpu.memory_space<vmem>>, vector<16x32xf32>
      %19 = vector.broadcast %13 : vector<1x32xf32> to vector<16x32xf32>
      %20 = arith.mulf %18, %19 : vector<16x32xf32>
      %21 = vector.broadcast %14 : vector<1x32xf32> to vector<16x32xf32>
      %22 = arith.addf %20, %21 : vector<16x32xf32>
      %cst_15 = arith.constant dense<0.000000e+00> : vector<16xf32>
      %23 = vector.multi_reduction <add>, %22, %cst_15 [1] : vector<16x32xf32> to vector<16xf32>
      %24 = vector.shape_cast %23 : vector<16xf32> to vector<16x1xf32>
      %25 = arith.mulf %22, %22 : vector<16x32xf32>
      %cst_16 = arith.constant dense<0.000000e+00> : vector<16xf32>
      %26 = vector.multi_reduction <add>, %25, %cst_16 [1] : vector<16x32xf32> to vector<16xf32>
      %27 = vector.shape_cast %26 : vector<16xf32> to vector<16x1xf32>
      %28 = vector.broadcast %17 : f32 to vector<16x1xf32>
      %29 = arith.mulf %24, %28 : vector<16x1xf32>
      %30 = vector.broadcast %17 : f32 to vector<16x1xf32>
      %31 = arith.mulf %27, %30 : vector<16x1xf32>
      %32 = arith.mulf %29, %29 : vector<16x1xf32>
      %33 = arith.subf %31, %32 : vector<16x1xf32>
      %cst_17 = arith.constant 0.000000e+00 : f32
      %34 = vector.broadcast %cst_17 : f32 to vector<16x1xf32>
      %35 = arith.maximumf %33, %34 : vector<16x1xf32>
      %cst_18 = arith.constant 9.99999974E-6 : f32
      %36 = vector.broadcast %cst_18 : f32 to vector<16x1xf32>
      %37 = arith.addf %35, %36 : vector<16x1xf32>
      %38 = math.rsqrt %37 : vector<16x1xf32>
      %39 = vector.broadcast %38 : vector<16x1xf32> to vector<16x32xf32>
      %40 = vector.broadcast %15 : vector<1x32xf32> to vector<16x32xf32>
      %41 = arith.mulf %39, %40 : vector<16x32xf32>
      %42 = vector.broadcast %29 : vector<16x1xf32> to vector<16x32xf32>
      %43 = arith.mulf %42, %41 : vector<16x32xf32>
      %44 = vector.broadcast %16 : vector<1x32xf32> to vector<16x32xf32>
      %45 = arith.subf %44, %43 : vector<16x32xf32>
      %46 = arith.mulf %22, %41 : vector<16x32xf32>
      %47 = arith.addf %46, %45 : vector<16x32xf32>
      %c0_19 = arith.constant 0 : index
      %c0_20 = arith.constant 0 : index
      %48 = vector.load %arg6[%c0_19, %c0_20] : memref<16x32xf32, #tpu.memory_space<vmem>>, vector<16x32xf32>
      tpu.vector_store %arg6[%c0_19, %c0_20], %47 {strides = array<i32>} : memref<16x32xf32, #tpu.memory_space<vmem>>, vector<16x32xf32>,
    } else {
    }
    return
  }
  func.func @transform_0(%arg0: i32, %arg1: i32) -> (i32, i32) {
    %c0_i32 = arith.constant 0 : i32
    return %arg0, %arg1 : i32, i32
  }
  func.func @transform_1(%arg0: i32, %arg1: i32) -> (i32, i32) {
    %c0_i32 = arith.constant 0 : i32
    %c0_i32_0 = arith.constant 0 : i32
    return %arg1, %c0_i32 : i32, i32
  }
  func.func @transform_2(%arg0: i32, %arg1: i32) -> (i32, i32) {
    %c0_i32 = arith.constant 0 : i32
    %c0_i32_0 = arith.constant 0 : i32
    %c0_i32_1 = arith.constant 0 : i32
    return %c0_i32, %c0_i32_0 : i32, i32
  }
  func.func @transform_3(%arg0: i32, %arg1: i32) -> i32 {
    %c0_i32 = arith.constant 0 : i32
    %c0_i32_0 = arith.constant 0 : i32
    return %c0_i32 : i32
  }
  func.func @transform_4(%arg0: i32, %arg1: i32) -> (i32, i32) {
    %c0_i32 = arith.constant 0 : i32
    %c0_i32_0 = arith.constant 0 : i32
    return %arg0, %c0_i32 : i32, i32
  }
}

</mosaic_0001>

<bundles_post_ra>
// kernel: tpu_custom_call.1
= control target key start
LH: loop header
LB: loop body
LE: loop exit
PB: predicated region body
PF: predicated region fallthrough
CT: control target
= control target key end

     0   :  { %10 = vsyncpa [#allocation5], 0  ;;  %s400_s0 = inlined_call_operand.hbm [shape: f32[16,32], index: 0, kind: input, shape index: {}]   ;;  %s401_s1 = inlined_call_operand.hbm [shape: f32[32,32], index: 1, kind: input, shape index: {}]   ;;  %s402_s2 = inlined_call_operand.hbm [shape: f32[8,32], index: 2, kind: input, shape index: {}]   ;;  %s403_s3 = inlined_call_operand.<no memory space> [shape: f32[1], index: 3, kind: input, shape index: {}]   ;;  %s404_s4 = inlined_call_operand.hbm [shape: f32[16,32], index: 4, kind: output, shape index: {}]  }
   0x1   :  { %11 = vsyncpa [#allocation8], 0 }
   0x2   :  { %12 = vsyncpa [#allocation6], 0  ;;  %s30_s17 = sshll.u32 %s401_s1, 4  ;;  %s326_s18 = smov [#allocation7]   ;;  %s31_s17 = int_to_ptr.hbm [resolvable:$true] %s30_s17 }
   0x3   :  { %s32_s19 = sshll.u32 %s326_s18, 4  ;;  %s17_s22 = sshll.u32 %s400_s0, 4  ;;  %s33_s19 = int_to_ptr.vmem [resolvable:$true] %s32_s19  ;;  %s18_s22 = int_to_ptr.hbm [resolvable:$true] %s17_s22 }
   0x4   :  { %s327_s23 = smov 128   ;;  %s328_s24 = smov 8  }
   0x5   :  { %38 = dma.hbm_to_vmem [thread:$0]  %s31_s17, 512, %s33_s19, [#allocation8], %s327_s23, %s327_s23, %s328_s24  }
   0x6   :  { %s329_s25 = smov [#allocation4]   ;;  %s44_s1 = sshll.u32 %s402_s2, 4  ;;  %s45_s1 = int_to_ptr.hbm [resolvable:$true] %s44_s1 }
   0x7   :  { %s19_s26 = sshll.u32 %s329_s25, 4  ;;  %s330_s0 = smov [#allocation9]   ;;  %s20_s26 = int_to_ptr.vmem [resolvable:$true] %s19_s26 }
   0x8   :  { %25 = dma.hbm_to_vmem [thread:$0]  %s18_s22, 256, %s20_s26, [#allocation5], %s327_s23, %s327_s23, %s328_s24  }
   0x9   :  { %s46_s29 = sshll.u32 %s330_s0, 4  ;;  %s47_s29 = int_to_ptr.vmem [resolvable:$true] %s46_s29 }
   0xa   :  { %49 = dma.hbm_to_vmem [thread:$0]  %s45_s1, 128, %s47_s29, [#allocation8]  }
   0xb   :  { %320 = dma.done.wait [#allocation5], 256  }
   0xc   :  { %321 = vsyncadd [#allocation5], 4294967040 }
   0xd   :  { %322 = dma.done.wait [#allocation8], 640  }
   0xe   :  { %323 = vsyncadd [#allocation8], 4294966656  ;;  %vm68_vm0 = vcmask 261120   ;;  %v331_v0 = vmov 0.0   ;;  %v78_v1 = vld [vmem:[#allocation7 + $0x18] sm:$0xff]  ;;  %v77_v2 = vld [vmem:[#allocation7 + $0x10] sm:$0xff]  ;;  %v140_v28 = vstv %s403_s3 }
   0xf   :  { %69 = vst.msk [vmem:[#allocation2] sm:$0xff] %vm68_vm0, %v331_v0  ;;  %98 = vmatpush.msra.mxu0 %v78_v1  ;;  %209 = vmatpush.msra.mxu1 %v78_v1  ;;  %v76_v3 = vld [vmem:[#allocation7 + $0x8] sm:$0xff]  ;;  %v75_v4 = vld [vmem:[#allocation7] sm:$0xff]  ;;  %v73_v5 = vld [vmem:[#allocation4] sm:$0xff]  ;;  %s332_s3 = smov [#allocation10]   ;;  %s193_s8 = sshll.u32 %s404_s4, 4  ;;  %s194_s8 = int_to_ptr.hbm [resolvable:$true] %s193_s8 }
  0x10   :  { %70 = vst.msk [vmem:[#allocation2 + $0x8] sm:$0xff] %vm68_vm0, %v331_v0  ;;  %v74_v6 = vld [vmem:[#allocation4 + $0x8] sm:$0xff]  ;;  %v379_v13 = vld [vmem:[#allocation9] sm:$0xff]  ;;  %s191_s5 = sshll.u32 %s332_s3, 4  ;;  %s192_s5 = int_to_ptr.vmem [resolvable:$true] %s191_s5 }
  0x11   :  { %99 = vmatpush.msra.mxu0 %v77_v2  ;;  %210 = vmatpush.msra.mxu1 %v77_v2  ;;  %v120_v14 = vperm.slane %v379_v13, 0  ;;  %v123_v15 = vperm.slane %v379_v13, 1  ;;  %v173_v51 = vperm.slane %v379_v13, 2  ;;  %v178_v57 = vperm.slane %v379_v13, 3 }
  0x13   :  { %100 = vmatpush.msra.mxu0 %v76_v3  ;;  %211 = vmatpush.msra.mxu1 %v76_v3 }
  0x15   :  { %101 = vmatpush.msra.mxu0 %v75_v4  ;;  %212 = vmatpush.msra.mxu1 %v75_v4 }
  0x16   :  { %207 = vmatmul.msk.f32.vlgmr.msra.gmra.mxu0 %vm68_vm0, %v73_v5  ;;  %208 = vmatmul.msk.f32.vlgmr.msra.gmra.mxu1 %vm68_vm0, %v74_v6  ;;  %v71_v7 = vld [vmem:[#allocation2] sm:$0xff] }
  0x17   :  { %v72_v8 = vld [vmem:[#allocation2 + $0x8] sm:$0xff] }
  0x93   :  { %v103_v9 = vpop.f32.mrf.mxu0  ;;  %v106_v10 = vpop.f32.mrf.mxu1 }
  0x94   :  { %v109_v11 = vadd.f32 %v103_v9, %v71_v7  ;;  %v110_v12 = vadd.f32 %v106_v10, %v72_v8 }
  0x96   :  { %111 = vst.msk [vmem:[#allocation2] sm:$0xff] %vm68_vm0, %v109_v11 }
  0x97   :  { %112 = vst.msk [vmem:[#allocation2 + $0x8] sm:$0xff] %vm68_vm0, %v110_v12 }
  0x9d   :  { %v118_v16 = vld [vmem:[#allocation2] sm:$0xff] }
  0x9e   :  { %v121_v17 = vmul.f32 %v120_v14, %v118_v16  ;;  %v119_v18 = vld [vmem:[#allocation2 + $0x8] sm:$0xff] }
  0x9f   :  { %v122_v19 = vmul.f32 %v120_v14, %v119_v18 }
  0xa0   :  { %v124_v20 = vadd.f32 %v123_v15, %v121_v17 }
  0xa1   :  { %v125_v23 = vadd.f32 %v123_v15, %v122_v19 }
  0xa2   :  { %v126_v21 = vsel %vm68_vm0, %v124_v20, 0.0  ;;  %v132_v22 = vmul.f32 %v124_v20, %v124_v20 }
  0xa3   :  { %127 = vadd.xlane.f32.xlu0 %v126_v21  ;;  %v133_v25 = vmul.f32 %v125_v23, %v125_v23  ;;  %v129_v26 = vsel %vm68_vm0, %v125_v23, 0.0 }
  0xa4   :  { %v134_v24 = vsel %vm68_vm0, %v132_v22, 0.0 }
  0xa5   :  { %135 = vadd.xlane.f32.xlu1 %v134_v24  ;;  %v137_v27 = vsel %vm68_vm0, %v133_v25, 0.0 }
  0xab   :  { %130 = vadd.xlane.f32.xlu0 %v129_v26 }
  0xad   :  { %138 = vadd.xlane.f32.xlu1 %v137_v27 }
 0x116   :  { %v128_v29 = vpop.xlane.xlu0 %127 }
 0x117   :  { %v141_v30 = vmul.f32 %v140_v28, %v128_v29 }
 0x118   :  { %v136_v31 = vpop.xlane.xlu1 %135 }
 0x119   :  { %v145_v32 = vmul.f32 %v141_v30, %v141_v30  ;;  %v143_v33 = vmul.f32 %v140_v28, %v136_v31 }
 0x11b   :  { %v147_v34 = vsub.f32 %v143_v33, %v145_v32 }
 0x11d   :  { %v149_v35 = vmax.f32 %v147_v34, 0.0 }
 0x11e   :  { %v131_v36 = vpop.xlane.xlu0 %130 }
 0x11f   :  { %v151_v37 = vadd.f32 1e-05, %v149_v35  ;;  %v142_v38 = vmul.f32 %v140_v28, %v131_v36 }
 0x120   :  { %v139_v39 = vpop.xlane.xlu1 %138 }
 0x121   :  { %220 = vrsqrt.f32 %v151_v37  ;;  %v146_v40 = vmul.f32 %v142_v38, %v142_v38  ;;  %v144_v41 = vmul.f32 %v140_v28, %v139_v39  ;;  %vm159_vm2 = vweird.f32 %v151_v37 }
 0x123   :  { %v148_v42 = vsub.f32 %v144_v41, %v146_v40 }
 0x125   :  { %v150_v43 = vmax.f32 %v148_v42, 0.0 }
 0x127   :  { %v221_v44 = vpop.eup %220  ;;  %v152_v45 = vadd.f32 1e-05, %v150_v43 }
 0x128   :  { %v154_v46 = vmul.f32 %v221_v44, %v151_v37  ;;  %vm160_vm1 = vweird.f32 %v221_v44 }
 0x129   :  { %222 = vrsqrt.f32 %v152_v45  ;;  %vm161_vm3 = vmor %vm159_vm2, %vm160_vm1  ;;  %vm169_vm5 = vweird.f32 %v152_v45 }
 0x12a   :  { %v155_v47 = vmul.f32 %v221_v44, %v154_v46 }
 0x12c   :  { %v156_v48 = vmul.f32 0.5, %v155_v47 }
 0x12e   :  { %v157_v49 = vsub.f32 1.5, %v156_v48 }
 0x12f   :  { %v223_v50 = vpop.eup %222 }
 0x130   :  { %v158_v52 = vmul.f32 %v221_v44, %v157_v49  ;;  %v164_v53 = vmul.f32 %v223_v50, %v152_v45  ;;  %vm170_vm4 = vweird.f32 %v223_v50 }
 0x131   :  { %vm171_vm6 = vmor %vm169_vm5, %vm170_vm4 }
 0x132   :  { %v162_v54 = vsel %vm161_vm3, %v221_v44, %v158_v52  ;;  %v165_v55 = vmul.f32 %v223_v50, %v164_v53 }
 0x133   :  { %v174_v56 = vmul.f32 %v173_v51, %v162_v54 }
 0x134   :  { %v166_v58 = vmul.f32 0.5, %v165_v55 }
 0x135   :  { %v176_v59 = vmul.f32 %v174_v56, %v141_v30  ;;  %v181_v62 = vmul.f32 %v174_v56, %v124_v20 }
 0x136   :  { %v167_v60 = vsub.f32 1.5, %v166_v58 }
 0x137   :  { %v179_v61 = vsub.f32 %v178_v57, %v176_v59 }
 0x138   :  { %v168_v63 = vmul.f32 %v223_v50, %v167_v60 }
 0x139   :  { %v183_v0 = vadd.f32 %v181_v62, %v179_v61 }
 0x13a   :  { %v172_v1 = vsel %vm171_vm6, %v223_v50, %v168_v63 }
 0x13b   :  { %v175_v2 = vmul.f32 %v173_v51, %v172_v1  ;;  %185 = vst.msk [vmem:[#allocation10] sm:$0xff] %vm68_vm0, %v183_v0 }
 0x13d   :  { %v177_v3 = vmul.f32 %v175_v2, %v142_v38  ;;  %v182_v5 = vmul.f32 %v175_v2, %v125_v23 }
 0x13f   :  { %v180_v4 = vsub.f32 %v178_v57, %v177_v3 }
 0x141   :  { %v184_v6 = vadd.f32 %v182_v5, %v180_v4 }
 0x143   :  { %186 = vst.msk [vmem:[#allocation10 + $0x8] sm:$0xff] %vm68_vm0, %v184_v6 }
 0x144   :  { %199 = dma.vmem_to_hbm [thread:$0]  %s192_s5, 256, %s194_s8, [#allocation6], %s327_s23, %s327_s23, %s328_s24  }
 0x145   :  { %324 = dma.done.wait [#allocation6], 256  }
 0x146   :  { %325 = vsyncadd [#allocation6], 4294967040 }
 0x147   :  { %204 = vsyncpa [#allocation5], 1 }
 0x148   :  { %205 = vsyncpa [#allocation8], 1 }
 0x149   :  { %206 = vsyncpa [#allocation6], 1 }

</bundles_post_ra>
